<compile_context>
chip_gen: v5e
topology: v5e:2x2
jax: 0.10.0
libtpu: 0.0.40
codegen_flags: <defaults>
</compile_context>

<pallas_src>
import functools

import jax
import jax.numpy as jnp
from jax.experimental import pallas as pl
from jax.experimental.pallas import tpu as pltpu


def _round_up(x, m):
    return ((x + m - 1) // m) * m


def _ce_kernel(logits_ref, targets_ref, weight_ref, num_ref, den_ref, *,
               n_rows, tile_b):
    """One batch tile -> per-tile partial (sum of weighted NLL, sum of weights)."""
    i = pl.program_id(0)

    x = logits_ref[...].astype(jnp.float32)        # (TB, C) upcast in VMEM
    t = targets_ref[...]                           # (TB, 1) int32
    w = weight_ref[...].astype(jnp.float32)        # (1, C)
    tb, c = x.shape

    # Row-validity mask: handles n_rows not a multiple of tile_b (edge block).
    row = jax.lax.broadcasted_iota(jnp.int32, (tb, 1), 0)
    valid = (i * tile_b + row) < n_rows            # (TB, 1) bool
    x = jnp.where(valid, x, 0.0)                   # keep overhang rows finite

    # Numerically-stable logsumexp over classes.
    m = jnp.max(x, axis=-1, keepdims=True)                                 # (TB,1)
    lse = m + jnp.log(jnp.sum(jnp.exp(x - m), axis=-1, keepdims=True))     # (TB,1)

    # Masked one-hot * class weight.  A single fused reduction then yields
    #   sum_c wm*(lse - x) = w[t]*(lse - x[t])   and   sum_c wm = w[t].
    cls = jax.lax.broadcasted_iota(jnp.int32, (tb, c), 1)
    wm = jnp.where(cls == t, w, 0.0) * valid.astype(jnp.float32)           # (TB,C)

    num_tile = jnp.sum(wm * (lse - x))     # sum_i w[t_i]*(lse_i - x_i[t_i])
    den_tile = jnp.sum(wm)                 # sum_i w[t_i]

    num_ref[...] = num_tile.reshape(1, 1, 1)
    den_ref[...] = den_tile.reshape(1, 1, 1)


def _choose_tile_b(n, c, logits_itemsize):
    """Largest 8-aligned batch tile whose double-buffered VMEM footprint fits."""
    try:
        vmem_cap = int(pltpu.get_tpu_info().vmem_capacity_bytes)
    except Exception:
        vmem_cap = 64 << 20          # v7x physical VMEM; conservative everywhere

    c_pad = _round_up(max(c, 1), 128)                    # VMEM lane padding
    # Per-row VMEM cost: logits tile row + lane-padded int32 targets row.
    per_row = c_pad * logits_itemsize + 128 * 4
    budget = max(int(vmem_cap * 0.4) - (2 << 20), 1 << 20)   # ~40% of VMEM
    tile_b = budget // (2 * per_row)                     # 2x: double-buffering
    tile_b = int(max(8, min(tile_b, 4096)))
    tile_b = (tile_b // 8) * 8
    tile_b = min(tile_b, max(8, (n // 8) * 8))           # don't dwarf the batch
    return tile_b, vmem_cap, c_pad, per_row


def cross_entropy_loss(logits, targets, weight=None, size_average=True, tile_b=None):
    """logits: (N, C) float (f32/bf16); targets: (N,) int; weight: optional (C,)."""
    n, c = logits.shape
    if weight is None:
        weight = jnp.ones((c,), jnp.float32)
    weight2d = jnp.asarray(weight, jnp.float32).reshape(1, c)

    itemsize = jnp.dtype(logits.dtype).itemsize
    auto_tile, vmem_cap, c_pad, per_row = _choose_tile_b(n, c, itemsize)
    if tile_b is None:
        tile_b = auto_tile
    tile_b = max(8, (int(tile_b) // 8) * 8)

    num_tiles = pl.cdiv(n, tile_b)
    n_pad = num_tiles * tile_b

    # Pad only the (cheap) targets vector to a whole number of tiles; padded /
    # overhanging rows are masked inside the kernel.  Logits are never copied.
    t32 = jnp.asarray(targets, jnp.int32)
    if n_pad != n:
        t32 = jnp.pad(t32, (0, n_pad - n))
    targets2d = t32.reshape(n_pad, 1)

    # Raise the scoped-VMEM limit so the large double-buffered tile fits.
    needed = 2 * tile_b * per_row + 2 * 8 * c_pad * 4 + (1 << 20)
    vmem_limit = int(min(vmem_cap * 0.9, max(needed + (8 << 20), 32 << 20)))

    kernel = functools.partial(_ce_kernel, n_rows=n, tile_b=tile_b)

    num_p, den_p = pl.pallas_call(
        kernel,
        out_shape=(
            jax.ShapeDtypeStruct((num_tiles, 1, 1), jnp.float32),
            jax.ShapeDtypeStruct((num_tiles, 1, 1), jnp.float32),
        ),
        grid_spec=pltpu.PrefetchScalarGridSpec(
            num_scalar_prefetch=0,
            grid=(num_tiles,),
            in_specs=[
                pl.BlockSpec((tile_b, c), lambda i: (i, 0)),   # logits tile
                pl.BlockSpec((tile_b, 1), lambda i: (i, 0)),   # target classes
                pl.BlockSpec((1, c), lambda i: (0, 0)),        # class weights (resident)
            ],
            out_specs=[
                pl.BlockSpec((1, 1, 1), lambda i: (i, 0, 0)),  # per-tile loss partial
                pl.BlockSpec((1, 1, 1), lambda i: (i, 0, 0)),  # per-tile weight partial
            ],
        ),
        compiler_params=pltpu.CompilerParams(
            dimension_semantics=("parallel",),   # independent tiles -> megacore on v7x
            vmem_limit_bytes=vmem_limit,
        ),
    )(logits, targets2d, weight2d)

    total_loss = jnp.sum(num_p)
    total_weight = jnp.sum(den_p)
    if size_average:
        # NaN if every selected class weight is zero (matches PyTorch).
        return total_loss / total_weight
    return total_loss
    # TODO(synk): ignore_index is not part of this module's config and is not supported.


if __name__ == "__main__":
    key = jax.random.PRNGKey(0)
    k1, k2, k3 = jax.random.split(key, 3)

    # Case 1: weighted mean, f32 logits (configer-provided class weights).
    n, c = 16, 10
    logits = jax.random.normal(k1, (n, c), dtype=jnp.float32)
    targets = jax.random.randint(k2, (n,), 0, c, dtype=jnp.int32)
    weight = 0.5 + 0.1 * jnp.arange(c, dtype=jnp.float32)

    loss = cross_entropy_loss(logits, targets, weight=weight, size_average=True)
    jax.block_until_ready(loss)

    logp = jax.nn.log_softmax(logits, axis=-1)
    nll = -logp[jnp.arange(n), targets]
    w_t = weight[targets]
    ref = jnp.sum(w_t * nll) / jnp.sum(w_t)
    assert jnp.allclose(loss, ref, atol=1e-5, rtol=1e-5), (loss, ref)

    # Case 2: unweighted mean, bf16 logits, ragged batch (exercises the mask).
    n2, c2 = 20, 12
    logits2_f32 = jax.random.normal(k3, (n2, c2), dtype=jnp.float32)
    targets2 = jax.random.randint(k2, (n2,), 0, c2, dtype=jnp.int32)
    logits2_bf16 = logits2_f32.astype(jnp.bfloat16)

    loss2 = cross_entropy_loss(logits2_bf16, targets2, weight=None,
                               size_average=True, tile_b=16)
    jax.block_until_ready(loss2)

    logp2 = jax.nn.log_softmax(logits2_bf16.astype(jnp.float32), axis=-1)
    ref2 = jnp.mean(-logp2[jnp.arange(n2), targets2])
    assert jnp.allclose(loss2, ref2, atol=1e-3, rtol=1e-3), (loss2, ref2)

    print("KERNEL_OK")
</pallas_src>

<mosaic_0001>
module attributes {stable_mosaic.version = 11 : i64} {
  func.func @_ce_kernel(%arg0: i32, %arg1: memref<16x10xf32, #tpu.memory_space<vmem>>, %arg2: memref<16x1xi32, #tpu.memory_space<vmem>>, %arg3: memref<1x10xf32, #tpu.memory_space<vmem>>, %arg4: memref<1x1x1xf32, #tpu.memory_space<vmem>>, %arg5: memref<1x1x1xf32, #tpu.memory_space<vmem>>) attributes {dimension_semantics = [#tpu.dimension_semantics<parallel>], iteration_bounds = array<i64: 1>, scalar_prefetch = 0 : i64, scratch_operands = 0 : i64, tpu.core_type = #tpu.core_type<tc>, window_params = [{transform_indices = @transform_0, window_bounds = array<i64: 16, 10>}, {transform_indices = @transform_1, window_bounds = array<i64: 16, 1>}, {pipeline_mode = #tpu.pipeline_mode<synchronous>, transform_indices = @transform_2, window_bounds = array<i64: 1, 10>}, {transform_indices = @transform_3, window_bounds = array<i64: 1, 1, 1>}, {transform_indices = @transform_4, window_bounds = array<i64: 1, 1, 1>}]} {
    %c0 = arith.constant 0 : index
    %c0_0 = arith.constant 0 : index
    %0 = vector.load %arg1[%c0, %c0_0] : memref<16x10xf32, #tpu.memory_space<vmem>>, vector<16x10xf32>
    %c0_1 = arith.constant 0 : index
    %c0_2 = arith.constant 0 : index
    %1 = vector.load %arg2[%c0_1, %c0_2] : memref<16x1xi32, #tpu.memory_space<vmem>>, vector<16x1xi32>
    %c0_3 = arith.constant 0 : index
    %c0_4 = arith.constant 0 : index
    %2 = vector.load %arg3[%c0_3, %c0_4] : memref<1x10xf32, #tpu.memory_space<vmem>>, vector<1x10xf32>
    %3 = tpu.iota {dimensions = array<i32: 0>} : vector<16x1xi32>
    %c16_i32 = arith.constant 16 : i32
    %4 = arith.muli %arg0, %c16_i32 : i32
    %5 = vector.broadcast %4 : i32 to vector<16x1xi32>
    %6 = arith.addi %5, %3 : vector<16x1xi32>
    %c16_i32_5 = arith.constant 16 : i32
    %7 = vector.broadcast %c16_i32_5 : i32 to vector<16x1xi32>
    %8 = arith.cmpi slt, %6, %7 : vector<16x1xi32>
    %cst = arith.constant 0.000000e+00 : f32
    %9 = vector.shape_cast %8 : vector<16x1xi1> to vector<16x1xi1>
    %10 = vector.broadcast %9 : vector<16x1xi1> to vector<16x10xi1>
    %11 = vector.broadcast %cst : f32 to vector<16x10xf32>
    %12 = arith.select %10, %0, %11 : vector<16x10xi1>, vector<16x10xf32>
    %cst_6 = arith.constant dense<0xFF800000> : vector<16xf32>
    %13 = vector.multi_reduction <maximumf>, %12, %cst_6 [1] : vector<16x10xf32> to vector<16xf32>
    %14 = vector.shape_cast %13 : vector<16xf32> to vector<16x1xf32>
    %15 = vector.broadcast %14 : vector<16x1xf32> to vector<16x10xf32>
    %16 = arith.subf %12, %15 : vector<16x10xf32>
    %17 = math.exp %16 : vector<16x10xf32>
    %cst_7 = arith.constant dense<0.000000e+00> : vector<16xf32>
    %18 = vector.multi_reduction <add>, %17, %cst_7 [1] : vector<16x10xf32> to vector<16xf32>
    %19 = vector.shape_cast %18 : vector<16xf32> to vector<16x1xf32>
    %20 = math.log %19 : vector<16x1xf32>
    %21 = arith.addf %14, %20 : vector<16x1xf32>
    %22 = tpu.iota {dimensions = array<i32: 1>} : vector<16x10xi32>
    %23 = vector.broadcast %1 : vector<16x1xi32> to vector<16x10xi32>
    %24 = arith.cmpi eq, %22, %23 : vector<16x10xi32>
    %cst_8 = arith.constant 0.000000e+00 : f32
    %25 = vector.shape_cast %2 : vector<1x10xf32> to vector<1x10xf32>
    %26 = vector.broadcast %25 : vector<1x10xf32> to vector<16x10xf32>
    %27 = vector.broadcast %cst_8 : f32 to vector<16x10xf32>
    %28 = arith.select %24, %26, %27 : vector<16x10xi1>, vector<16x10xf32>
    %29 = arith.extui %8 : vector<16x1xi1> to vector<16x1xi32>
    %30 = arith.sitofp %29 : vector<16x1xi32> to vector<16x1xf32>
    %31 = vector.broadcast %30 : vector<16x1xf32> to vector<16x10xf32>
    %32 = arith.mulf %28, %31 : vector<16x10xf32>
    %33 = vector.broadcast %21 : vector<16x1xf32> to vector<16x10xf32>
    %34 = arith.subf %33, %12 : vector<16x10xf32>
    %35 = arith.mulf %32, %34 : vector<16x10xf32>
    %36 = vector.shape_cast %35 : vector<16x10xf32> to vector<1x16x10xf32>
    %cst_9 = arith.constant dense<0.000000e+00> : vector<1xf32>
    %37 = vector.multi_reduction <add>, %36, %cst_9 [1, 2] : vector<1x16x10xf32> to vector<1xf32>
    %38 = vector.shape_cast %37 : vector<1xf32> to vector<1x1x1xf32>
    %39 = vector.extract %38[0, 0, 0] : f32 from vector<1x1x1xf32>
    %40 = vector.shape_cast %32 : vector<16x10xf32> to vector<1x16x10xf32>
    %cst_10 = arith.constant dense<0.000000e+00> : vector<1xf32>
    %41 = vector.multi_reduction <add>, %40, %cst_10 [1, 2] : vector<1x16x10xf32> to vector<1xf32>
    %42 = vector.shape_cast %41 : vector<1xf32> to vector<1x1x1xf32>
    %43 = vector.extract %42[0, 0, 0] : f32 from vector<1x1x1xf32>
    %44 = vector.broadcast %39 : f32 to vector<1x1x1xf32>
    %c0_11 = arith.constant 0 : index
    %c0_12 = arith.constant 0 : index
    %c0_13 = arith.constant 0 : index
    %45 = vector.load %arg4[%c0_11, %c0_12, %c0_13] : memref<1x1x1xf32, #tpu.memory_space<vmem>>, vector<1x1x1xf32>
    tpu.vector_store %arg4[%c0_11, %c0_12, %c0_13], %44 {strides = array<i32>} : memref<1x1x1xf32, #tpu.memory_space<vmem>>, vector<1x1x1xf32>,
    %46 = vector.broadcast %43 : f32 to vector<1x1x1xf32>
    %c0_14 = arith.constant 0 : index
    %c0_15 = arith.constant 0 : index
    %c0_16 = arith.constant 0 : index
    %47 = vector.load %arg5[%c0_14, %c0_15, %c0_16] : memref<1x1x1xf32, #tpu.memory_space<vmem>>, vector<1x1x1xf32>
    tpu.vector_store %arg5[%c0_14, %c0_15, %c0_16], %46 {strides = array<i32>} : memref<1x1x1xf32, #tpu.memory_space<vmem>>, vector<1x1x1xf32>,
    return
  }
  func.func @transform_0(%arg0: i32) -> (i32, i32) {
    %c0_i32 = arith.constant 0 : i32
    %c0_i32_0 = arith.constant 0 : i32
    return %arg0, %c0_i32 : i32, i32
  }
  func.func @transform_1(%arg0: i32) -> (i32, i32) {
    %c0_i32 = arith.constant 0 : i32
    %c0_i32_0 = arith.constant 0 : i32
    return %arg0, %c0_i32 : i32, i32
  }
  func.func @transform_2(%arg0: i32) -> (i32, i32) {
    %c0_i32 = arith.constant 0 : i32
    %c0_i32_0 = arith.constant 0 : i32
    %c0_i32_1 = arith.constant 0 : i32
    return %c0_i32, %c0_i32_0 : i32, i32
  }
  func.func @transform_3(%arg0: i32) -> (i32, i32, i32) {
    %c0_i32 = arith.constant 0 : i32
    %c0_i32_0 = arith.constant 0 : i32
    %c0_i32_1 = arith.constant 0 : i32
    return %arg0, %c0_i32, %c0_i32_0 : i32, i32, i32
  }
  func.func @transform_4(%arg0: i32) -> (i32, i32, i32) {
    %c0_i32 = arith.constant 0 : i32
    %c0_i32_0 = arith.constant 0 : i32
    %c0_i32_1 = arith.constant 0 : i32
    return %arg0, %c0_i32, %c0_i32_0 : i32, i32, i32
  }
}

</mosaic_0001>

<bundles_post_ra>
// kernel: tpu_custom_call.1
= control target key start
LH: loop header
LB: loop body
LE: loop exit
PB: predicated region body
PF: predicated region fallthrough
CT: control target
= control target key end

     0   :  { %10 = vsyncpa [#allocation3], 0  ;;  %vm38_vm0 = vcmask 80896   ;;  %s274_s0 = inlined_call_operand.vmem [shape: f32[16,10], index: 0, kind: input, shape index: {}]   ;;  %s275_s1 = inlined_call_operand.vmem [shape: s32[16,1], index: 1, kind: input, shape index: {}]   ;;  %s276_s2 = inlined_call_operand.vmem [shape: f32[1,10], index: 2, kind: input, shape index: {}]   ;;  %s277_s3 = inlined_call_operand.hbm [shape: f32[1,1,1], index: 3, kind: output, shape index: {0}]   ;;  %s278_s4 = inlined_call_operand.hbm [shape: f32[1,1,1], index: 4, kind: output, shape index: {1}]  }
   0x1   :  { %v18_v0 = vld [vmem:[%s274_s0] sm:$0xff] }
   0x2   :  { %v39_v1 = vsel %vm38_vm0, %v18_v0, -inf }
   0x3   :  { %11 = vsyncpa [#allocation5], 0  ;;  %40 = vmax.xlane.f32.xlu0 %v39_v1  ;;  %v19_v2 = vld [vmem:[%s274_s0 + $0x8] sm:$0xff]  ;;  %v20_v4 = vld [vmem:[%s275_s1] sm:$0xff]  ;;  %v217_v5 = vmov 0   ;;  %v63_v17 = vlaneseq  ;;  %s122_s26 = sshll.u32 %s277_s3, 4  ;;  %s123_s26 = int_to_ptr.hbm [resolvable:$true] %s122_s26 }
   0x4   :  { %v42_v3 = vsel %vm38_vm0, %v19_v2, -inf  ;;  %154 = vset.pattern.permute.xlu2 %v217_v5  ;;  %155 = vset.pattern.permute.xlu0 %v217_v5  ;;  %v21_v6 = vld [vmem:[%s275_s1 + $0x8] sm:$0xff]  ;;  %v156_v20 = vld [vmem:[%s276_s2] ss:$0 sm:$0xff]  ;;  %s218_s2 = smov [#allocation2]   ;;  %s219_s27 = smov [#allocation4]  }
   0x5   :  { %66 = vperm.xlu2 %154, %v20_v4   ;;  %v64_v19 = vand.u32 127, %v63_v17  ;;  %s120_s23 = sshll.u32 %s218_s2, 4  ;;  %s131_s28 = sshll.u32 %s219_s27, 4  ;;  %vm111_vm3 = vcmask 0   ;;  %s121_s23 = int_to_ptr.vmem [resolvable:$true] %s120_s23  ;;  %s132_s28 = int_to_ptr.vmem [resolvable:$true] %s131_s28 }
   0x6   :  { %s133_s5 = sshll.u32 %s278_s4, 4  ;;  %s134_s5 = int_to_ptr.hbm [resolvable:$true] %s133_s5 }
   0xb   :  { %43 = vmax.xlane.f32.xlu0 %v42_v3 }
   0xd   :  { %69 = vperm.xlu2 %154, %v21_v6  }
  0x5f   :  { %v67_v18 = vpop.permute.xlu2 %66 }
  0x60   :  { %vm71_vm1 = vcmp.eq.s32.totalorder %v64_v19, %v67_v18 }
  0x61   :  { %v76_v21 = vsel %vm71_vm1, %v156_v20, 0.0 }
  0x62   :  { %v98_v24 = vsel %vm38_vm0, %v76_v21, 0.0 }
  0x67   :  { %v70_v22 = vpop.permute.xlu2 %69 }
  0x68   :  { %vm72_vm2 = vcmp.eq.s32.totalorder %v64_v19, %v70_v22 }
  0x69   :  { %v77_v23 = vsel %vm72_vm2, %v156_v20, 0.0 }
  0x6a   :  { %v99_v25 = vsel %vm38_vm0, %v77_v23, 0.0 }
  0x6b   :  { %v100_v26 = vadd.f32 %v99_v25, %v98_v24 }
  0x76   :  { %v41_v7 = vpop.xlane.xlu0 %40 }
  0x77   :  { %v45_v8 = vsub.f32 %v18_v0, %v41_v7 }
  0x79   :  { %v47_v9 = vmul.f32 1.442695, %v45_v8 }
  0x7b   :  { %157 = vpow2.f32 %v47_v9 }
  0x7e   :  { %v44_v10 = vpop.xlane.xlu0 %43 }
  0x7f   :  { %v46_v11 = vsub.f32 %v19_v2, %v44_v10 }
  0x81   :  { %v158_v12 = vpop.eup %157  ;;  %v49_v13 = vmul.f32 1.442695, %v46_v11 }
  0x82   :  { %v51_v14 = vsel %vm38_vm0, %v158_v12, 0.0 }
  0x83   :  { %159 = vpow2.f32 %v49_v13  ;;  %52 = vadd.xlane.f32.xlu1 %v51_v14 }
  0x89   :  { %v160_v15 = vpop.eup %159 }
  0x8a   :  { %v54_v16 = vsel %vm38_vm0, %v160_v15, 0.0 }
  0x8b   :  { %55 = vadd.xlane.f32.xlu1 %v54_v16 }
  0x93   :  { %101 = vadd.xlane.f32.xlu1 %v100_v26 }
  0xf6   :  { %v53_v27 = vpop.xlane.xlu1 %52 }
  0xf7   :  { %161 = vlog2.f32 %v53_v27 }
  0xfd   :  { %v162_v28 = vpop.eup %161 }
  0xfe   :  { %v58_v29 = vmul.f32 0.6931472, %v162_v28  ;;  %v56_v30 = vpop.xlane.xlu1 %55 }
  0xff   :  { %163 = vlog2.f32 %v56_v30 }
 0x100   :  { %v61_v31 = vadd.f32 %v58_v29, %v41_v7 }
 0x102   :  { %v82_v33 = vsub.f32 %v61_v31, %v18_v0 }
 0x104   :  { %v84_v37 = vmul.f32 %v82_v33, %v76_v21 }
 0x105   :  { %v164_v32 = vpop.eup %163 }
 0x106   :  { %v60_v34 = vmul.f32 0.6931472, %v164_v32  ;;  %v86_v39 = vsel %vm38_vm0, %v84_v37, 0.0  ;;  %v102_v42 = vpop.xlane.xlu1 %101 }
 0x107   :  { %v103_v43 = vrot.slane %v102_v42, 4 }
 0x108   :  { %v62_v35 = vadd.f32 %v60_v34, %v44_v10 }
 0x109   :  { %v104_v44 = vadd.f32 %v103_v43, %v102_v42 }
 0x10a   :  { %v83_v36 = vsub.f32 %v62_v35, %v19_v2 }
 0x10b   :  { %v105_v45 = vrot.slane %v104_v44, 2 }
 0x10c   :  { %v85_v38 = vmul.f32 %v83_v36, %v77_v23 }
 0x10d   :  { %v106_v49 = vadd.f32 %v105_v45, %v104_v44 }
 0x10e   :  { %v87_v40 = vsel %vm38_vm0, %v85_v38, 0.0 }
 0x10f   :  { %v88_v41 = vadd.f32 %v87_v40, %v86_v39  ;;  %v107_v52 = vrot.slane %v106_v49, 1 }
 0x111   :  { %89 = vadd.xlane.f32.xlu0 %v88_v41  ;;  %v108_v55 = vadd.f32 %v107_v52, %v106_v49 }
 0x184   :  { %v90_v46 = vpop.xlane.xlu0 %89 }
 0x185   :  { %v91_v47 = vrot.slane %v90_v46, 4 }
 0x187   :  { %v92_v48 = vadd.f32 %v91_v47, %v90_v46 }
 0x189   :  { %v93_v50 = vrot.slane %v92_v48, 2 }
 0x18b   :  { %v94_v51 = vadd.f32 %v93_v50, %v92_v48 }
 0x18d   :  { %v95_v53 = vrot.slane %v94_v51, 1 }
 0x18f   :  { %v96_v54 = vadd.f32 %v95_v53, %v94_v51 }
 0x191   :  { %147 = vpush %v96_v54 }
 0x192   :  { %149 = vpush %v108_v55 }
 0x1c2   :  { %s148_s6 = spop %147 }
 0x1c3   :  { %v110_v56 = vstv %s148_s6  ;;  %s150_s7 = spop %149 }
 0x1c4   :  { %112 = vst.msk [vmem:[#allocation2] sm:$0x1] %vm111_vm3, %v110_v56  ;;  %v113_v57 = vstv %s150_s7 }
 0x1c5   :  { %114 = vst.msk [vmem:[#allocation4] sm:$0x1] %vm111_vm3, %v113_v57  ;;  %125 = dma.vmem_to_hbm [thread:$0]  %s121_s23, 16, %s123_s26, [#allocation3]  }
 0x1c6   :  { %136 = dma.vmem_to_hbm [thread:$0]  %s132_s28, 16, %s134_s5, [#allocation5]  }
 0x1c7   :  { %213 = dma.done.wait [#allocation3], 16  }
 0x1c8   :  { %214 = vsyncadd [#allocation3], 4294967280 }
 0x1c9   :  { %215 = dma.done.wait [#allocation5], 16  }
 0x1ca   :  { %216 = vsyncadd [#allocation5], 4294967280 }
 0x1cb   :  { %145 = vsyncpa [#allocation3], 1 }
 0x1cc   :  { %146 = vsyncpa [#allocation5], 1 }

</bundles_post_ra>
